<compile_context>
chip_gen: v6e
topology: v6e:2x2x1
jax: 0.10.0
libtpu: 0.0.40
codegen_flags: <defaults>
</compile_context>

<pallas_src>
import functools

import jax
import jax.numpy as jnp
from jax.experimental import pallas as pl
from jax.experimental.pallas import tpu as pltpu

_LANE = 128


def _selector_kernel(xcat_ref, wenc_ref, benc_ref, w1_ref, b1_ref,
                     w2_ref, b2_ref, out_ref):
    """One edge tile of the fused RLNeighborSelector MLP (transposed layout)."""
    f32 = jnp.float32

    # enc = ReLU(Wenc @ xcat + benc)   -- fused pre-ReLU linear chain
    enc = jnp.dot(wenc_ref[...], xcat_ref[...], preferred_element_type=f32)
    enc = jnp.maximum(enc + benc_ref[...], 0.0)                 # [H, tile_e]

    # h = ReLU(W1 @ enc + b1)          -- fused value/policy first layers
    h = jnp.dot(w1_ref[...], enc.astype(w1_ref.dtype),
                preferred_element_type=f32)
    h = jnp.maximum(h + b1_ref[...], 0.0)                       # [H//2+H, tile_e]

    # heads = W2 @ h + b2              -- block-diagonal fused second layers
    heads = jnp.dot(w2_ref[...], h.astype(w2_ref.dtype),
                    preferred_element_type=f32) + b2_ref[...]   # [2, tile_e]

    value = heads[0:1, :]                                       # [1, tile_e]
    probs = jax.nn.sigmoid(heads[1:2, :])                       # [1, tile_e]
    actions = (probs > 0.5).astype(f32)

    # Lane-dense packed output: row 0 = value, row 1 = prob, row 2 = action.
    out_ref[0:1, :] = value
    out_ref[1:2, :] = probs
    out_ref[2:3, :] = actions


def fuse_params(params):
    """Fold the linear chain + heads into 3 fused layers (host-side, once).

    Returned weights are transposed ([out, in]) for the edges-on-lanes layout.
    """
    H = params["wn"].shape[1]
    Hh = params["wv1"].shape[1]

    wenc = jnp.concatenate([params["wn"] @ params["we1"],
                            params["wnb"] @ params["we2"],
                            params["wg"] @ params["we3"]], axis=0)   # [2C+H, H]
    benc = (params["bn"] @ params["we1"] + params["bnb"] @ params["we2"]
            + params["bg"] @ params["we3"] + params["be"])           # [1, H]

    w1 = jnp.concatenate([params["wv1"], params["wp1"]], axis=1)     # [H, Hh+H]
    b1 = jnp.concatenate([params["bv1"], params["bp1"]], axis=1)     # [1, Hh+H]

    w2 = jnp.zeros((Hh + H, 2), jnp.float32)
    w2 = w2.at[:Hh, 0:1].set(params["wv2"])                          # value col
    w2 = w2.at[Hh:, 1:2].set(params["wp2"])                          # policy col
    b2 = jnp.concatenate([params["bv2"], params["bp2"]], axis=1)     # [1, 2]

    return {"wenc_t": wenc.T, "benc_t": benc.T,
            "w1_t": w1.T, "b1_t": b1.T,
            "w2_t": w2.T, "b2_t": b2.T}


@functools.partial(jax.jit, static_argnames=("max_tile_e", "compute_dtype"))
def _forward_core(x, guidance, row, col, fused, *,
                  max_tile_e=4096, compute_dtype=jnp.float32):
    E = row.shape[0]
    D_in = fused["wenc_t"].shape[1]          # 2C + H

    # Gather + concat + transpose fused into this jit so the per-edge state is
    # fed straight into the kernel instead of round-tripping HBM eagerly.
    # TODO(synk): a further step would be in-kernel row gather via scalar
    # prefetch (pl.Element index_map) to avoid materializing [D_in, E] at all.
    xcat_t = jnp.concatenate([x[row], x[col], guidance[col]], axis=1).T  # [D_in,E]

    # Edge-axis tiling: big 128-multiple tiles amortize per-grid-step overhead;
    # keep >=2 blocks when E allows so v7x's two TensorCores both get work.
    max_tile_e = max(_LANE, (int(max_tile_e) // _LANE) * _LANE)
    tile_e = min(max_tile_e, pl.cdiv(E, _LANE) * _LANE)
    if tile_e >= E and E > 2 * _LANE:
        tile_e = pl.cdiv(pl.cdiv(E, 2), _LANE) * _LANE
    E_pad = pl.cdiv(E, tile_e) * tile_e
    if E_pad != E:
        xcat_t = jnp.pad(xcat_t, ((0, 0), (0, E_pad - E)))

    cd = compute_dtype
    xcat_t = xcat_t.astype(cd)
    wenc_t = fused["wenc_t"].astype(cd)
    w1_t = fused["w1_t"].astype(cd)
    w2_t = fused["w2_t"].astype(cd)
    benc_t = fused["benc_t"].astype(jnp.float32)   # epilogue math stays f32
    b1_t = fused["b1_t"].astype(jnp.float32)
    b2_t = fused["b2_t"].astype(jnp.float32)

    def full_spec(a):
        return pl.BlockSpec(a.shape, lambda i: (0, 0))

    out = pl.pallas_call(
        _selector_kernel,
        out_shape=jax.ShapeDtypeStruct((3, E_pad), jnp.float32),
        grid_spec=pltpu.PrefetchScalarGridSpec(
            num_scalar_prefetch=0,
            grid=(E_pad // tile_e,),
            in_specs=[pl.BlockSpec((D_in, tile_e), lambda i: (0, i)),
                      full_spec(wenc_t), full_spec(benc_t),
                      full_spec(w1_t), full_spec(b1_t),
                      full_spec(w2_t), full_spec(b2_t)],
            out_specs=pl.BlockSpec((3, tile_e), lambda i: (0, i)),
        ),
        compiler_params=pltpu.CompilerParams(
            dimension_semantics=("parallel",)),
    )(xcat_t, wenc_t, benc_t, w1_t, b1_t, w2_t, b2_t)

    # Slice off the padded edges before anything data-dependent sees them.
    value_preds = out[0, :E].reshape(E, 1)
    action_probs = out[1, :E].reshape(E, 1)
    actions = out[2, :E].reshape(E, 1)
    return value_preds, action_probs, actions


def rl_neighbor_selector_forward(x, edge_index, guidance, params, *,
                                 max_tile_e=4096, compute_dtype=jnp.float32):
    """Eval-mode forward.

    Returns (selected_edge_index, value_loss, actions, value_preds, action_probs).
    """
    fused = fuse_params(params)
    row = edge_index[0]
    col = edge_index[1]
    value_preds, action_probs, actions = _forward_core(
        x, guidance, row, col, fused,
        max_tile_e=max_tile_e, compute_dtype=compute_dtype)

    # Eval mode: no loss (training-mode BCE + policy loss not translated).
    value_loss = jnp.float32(0.0)

    # Glue: data-dependent variable-length selection (eager, outside jit).
    sel = jnp.where(actions[:, 0] > 0)[0]
    if sel.shape[0] == 0:
        # Fallback matches torch.randint(0, E, (E // 10,)).
        sel = jax.random.randint(
            jax.random.PRNGKey(123), (edge_index.shape[1] // 10,),
            0, edge_index.shape[1])
    selected_edge_index = edge_index[:, sel]

    return selected_edge_index, value_loss, actions, value_preds, action_probs


def init_params(key, in_channels, hidden_channels):
    """Deterministic synthetic parameters (Linear weights in [in, out] layout)."""
    H = hidden_channels
    Hh = H // 2
    keys = jax.random.split(key, 20)
    k = iter(keys)

    def lin(kw, kb, fan_in, fan_out):
        scale = 1.0 / jnp.sqrt(jnp.float32(fan_in))
        w = jax.random.uniform(kw, (fan_in, fan_out), jnp.float32, -scale, scale)
        b = jax.random.uniform(kb, (1, fan_out), jnp.float32, -scale, scale)
        return w, b

    p = {}
    p["wn"], p["bn"] = lin(next(k), next(k), in_channels, H)      # node_transform
    p["wnb"], p["bnb"] = lin(next(k), next(k), in_channels, H)    # neighbor_transform
    p["wg"], p["bg"] = lin(next(k), next(k), H, H)                # guidance_transform
    we, be = lin(next(k), next(k), 3 * H, H)                      # state_encoder Linear
    p["we1"], p["we2"], p["we3"] = we[:H], we[H:2 * H], we[2 * H:]
    p["be"] = be
    p["wv1"], p["bv1"] = lin(next(k), next(k), H, Hh)             # value_predictor.0
    p["wv2"], p["bv2"] = lin(next(k), next(k), Hh, 1)             # value_predictor.3
    p["wp1"], p["bp1"] = lin(next(k), next(k), H, H)              # policy_net.0
    p["wp2"], p["bp2"] = lin(next(k), next(k), H, 1)              # policy_net.3
    return p


if __name__ == "__main__":
    in_channels = 8
    hidden_channels = 32
    num_nodes = 16
    num_edges = 300   # not a multiple of 128: exercises padding + a 2-block grid

    key = jax.random.PRNGKey(0)
    kx, kg, ke, kp = jax.random.split(key, 4)

    x = jax.random.normal(kx, (num_nodes, in_channels), jnp.float32)
    guidance = jax.random.normal(kg, (num_nodes, hidden_channels), jnp.float32)
    edge_index = jax.random.randint(ke, (2, num_edges), 0, num_nodes, jnp.int32)

    params = init_params(kp, in_channels, hidden_channels)

    (selected_edge_index, value_loss, actions, value_preds, action_probs) = (
        rl_neighbor_selector_forward(x, edge_index, guidance, params))
    jax.block_until_ready((selected_edge_index, value_loss, actions))

    # Pure-JAX reference of the unfused module math (eval mode).
    row, col = edge_index[0], edge_index[1]
    nf = x[row] @ params["wn"] + params["bn"]
    nbf = x[col] @ params["wnb"] + params["bnb"]
    gf = guidance[col] @ params["wg"] + params["bg"]
    enc = jnp.maximum(
        nf @ params["we1"] + nbf @ params["we2"] + gf @ params["we3"]
        + params["be"], 0.0)
    v_ref = (jnp.maximum(enc @ params["wv1"] + params["bv1"], 0.0)
             @ params["wv2"] + params["bv2"])
    p_ref = jax.nn.sigmoid(
        jnp.maximum(enc @ params["wp1"] + params["bp1"], 0.0)
        @ params["wp2"] + params["bp2"])

    assert jnp.allclose(value_preds, v_ref, atol=1e-4), "value mismatch"
    assert jnp.allclose(action_probs, p_ref, atol=1e-4), "prob mismatch"
    clear = jnp.abs(p_ref[:, 0] - 0.5) > 1e-3      # ignore knife-edge probs
    a_ref = (p_ref[:, 0] > 0.5).astype(jnp.float32)
    assert jnp.all((actions[:, 0] == a_ref) | ~clear), "action mismatch"

    # bf16 input/weight path (f32 MXU accumulation) -- v6e/v7x bandwidth option.
    _, _, _, v_bf16, p_bf16 = rl_neighbor_selector_forward(
        x, edge_index, guidance, params, compute_dtype=jnp.bfloat16)
    jax.block_until_ready((v_bf16, p_bf16))
    assert jnp.allclose(v_bf16, v_ref, atol=0.1), "bf16 value mismatch"
    assert jnp.allclose(p_bf16, p_ref, atol=0.1), "bf16 prob mismatch"

    print("KERNEL_OK")
</pallas_src>

<mosaic_0001>
module attributes {stable_mosaic.version = 11 : i64} {
  func.func @_selector_kernel(%arg0: i32, %arg1: memref<48x256xf32, #tpu.memory_space<vmem>>, %arg2: memref<32x48xf32, #tpu.memory_space<vmem>>, %arg3: memref<32x1xf32, #tpu.memory_space<vmem>>, %arg4: memref<48x32xf32, #tpu.memory_space<vmem>>, %arg5: memref<48x1xf32, #tpu.memory_space<vmem>>, %arg6: memref<2x48xf32, #tpu.memory_space<vmem>>, %arg7: memref<2x1xf32, #tpu.memory_space<vmem>>, %arg8: memref<3x256xf32, #tpu.memory_space<vmem>>) attributes {dimension_semantics = [#tpu.dimension_semantics<parallel>], iteration_bounds = array<i64: 2>, scalar_prefetch = 0 : i64, scratch_operands = 0 : i64, tpu.core_type = #tpu.core_type<tc>, window_params = [{transform_indices = @transform_0, window_bounds = array<i64: 48, 256>}, {pipeline_mode = #tpu.pipeline_mode<synchronous>, transform_indices = @transform_1, window_bounds = array<i64: 32, 48>}, {pipeline_mode = #tpu.pipeline_mode<synchronous>, transform_indices = @transform_2, window_bounds = array<i64: 32, 1>}, {pipeline_mode = #tpu.pipeline_mode<synchronous>, transform_indices = @transform_3, window_bounds = array<i64: 48, 32>}, {pipeline_mode = #tpu.pipeline_mode<synchronous>, transform_indices = @transform_4, window_bounds = array<i64: 48, 1>}, {pipeline_mode = #tpu.pipeline_mode<synchronous>, transform_indices = @transform_5, window_bounds = array<i64: 2, 48>}, {pipeline_mode = #tpu.pipeline_mode<synchronous>, transform_indices = @transform_6, window_bounds = array<i64: 2, 1>}, {transform_indices = @transform_7, window_bounds = array<i64: 3, 256>}]} {
    %c0 = arith.constant 0 : index
    %c0_0 = arith.constant 0 : index
    %0 = vector.load %arg2[%c0, %c0_0] : memref<32x48xf32, #tpu.memory_space<vmem>>, vector<32x48xf32>
    %c0_1 = arith.constant 0 : index
    %c0_2 = arith.constant 0 : index
    %1 = vector.load %arg1[%c0_1, %c0_2] : memref<48x256xf32, #tpu.memory_space<vmem>>, vector<48x256xf32>
    %cst = arith.constant dense<0.000000e+00> : vector<32x256xf32>
    %2 = tpu.matmul %0, %1, %cst {dimension_numbers = #tpu.dot_dimension_numbers<[1], [0], [0], [1], [0, 0, 1, 1], [], []>} : vector<32x48xf32>, vector<48x256xf32>, vector<32x256xf32> -> vector<32x256xf32>
    %c0_3 = arith.constant 0 : index
    %c0_4 = arith.constant 0 : index
    %3 = vector.load %arg3[%c0_3, %c0_4] : memref<32x1xf32, #tpu.memory_space<vmem>>, vector<32x1xf32>
    %4 = vector.broadcast %3 : vector<32x1xf32> to vector<32x256xf32>
    %5 = arith.addf %2, %4 : vector<32x256xf32>
    %cst_5 = arith.constant 0.000000e+00 : f32
    %6 = vector.broadcast %cst_5 : f32 to vector<32x256xf32>
    %7 = arith.maximumf %5, %6 : vector<32x256xf32>
    %c0_6 = arith.constant 0 : index
    %c0_7 = arith.constant 0 : index
    %8 = vector.load %arg4[%c0_6, %c0_7] : memref<48x32xf32, #tpu.memory_space<vmem>>, vector<48x32xf32>
    %cst_8 = arith.constant dense<0.000000e+00> : vector<48x256xf32>
    %9 = tpu.matmul %8, %7, %cst_8 {dimension_numbers = #tpu.dot_dimension_numbers<[1], [0], [0], [1], [0, 0, 1, 1], [], []>} : vector<48x32xf32>, vector<32x256xf32>, vector<48x256xf32> -> vector<48x256xf32>
    %c0_9 = arith.constant 0 : index
    %c0_10 = arith.constant 0 : index
    %10 = vector.load %arg5[%c0_9, %c0_10] : memref<48x1xf32, #tpu.memory_space<vmem>>, vector<48x1xf32>
    %11 = vector.broadcast %10 : vector<48x1xf32> to vector<48x256xf32>
    %12 = arith.addf %9, %11 : vector<48x256xf32>
    %cst_11 = arith.constant 0.000000e+00 : f32
    %13 = vector.broadcast %cst_11 : f32 to vector<48x256xf32>
    %14 = arith.maximumf %12, %13 : vector<48x256xf32>
    %c0_12 = arith.constant 0 : index
    %c0_13 = arith.constant 0 : index
    %15 = vector.load %arg6[%c0_12, %c0_13] : memref<2x48xf32, #tpu.memory_space<vmem>>, vector<2x48xf32>
    %cst_14 = arith.constant dense<0.000000e+00> : vector<2x256xf32>
    %16 = tpu.matmul %15, %14, %cst_14 {dimension_numbers = #tpu.dot_dimension_numbers<[1], [0], [0], [1], [0, 0, 1, 1], [], []>} : vector<2x48xf32>, vector<48x256xf32>, vector<2x256xf32> -> vector<2x256xf32>
    %c0_15 = arith.constant 0 : index
    %c0_16 = arith.constant 0 : index
    %17 = vector.load %arg7[%c0_15, %c0_16] : memref<2x1xf32, #tpu.memory_space<vmem>>, vector<2x1xf32>
    %18 = vector.broadcast %17 : vector<2x1xf32> to vector<2x256xf32>
    %19 = arith.addf %16, %18 : vector<2x256xf32>
    %20 = vector.extract_strided_slice %19 {offsets = [0, 0], sizes = [1, 256], strides = [1, 1]} : vector<2x256xf32> to vector<1x256xf32>
    %21 = vector.extract_strided_slice %19 {offsets = [1, 0], sizes = [1, 256], strides = [1, 1]} : vector<2x256xf32> to vector<1x256xf32>
    %22 = arith.negf %21 : vector<1x256xf32>
    %23 = math.exp %22 : vector<1x256xf32>
    %cst_17 = arith.constant 1.000000e+00 : f32
    %24 = vector.broadcast %cst_17 : f32 to vector<1x256xf32>
    %25 = arith.addf %24, %23 : vector<1x256xf32>
    %26 = arith.divf %24, %25 : vector<1x256xf32>
    %cst_18 = arith.constant 5.000000e-01 : f32
    %27 = vector.broadcast %cst_18 : f32 to vector<1x256xf32>
    %28 = arith.cmpf ogt, %26, %27 : vector<1x256xf32>
    %29 = arith.extui %28 : vector<1x256xi1> to vector<1x256xi32>
    %30 = arith.sitofp %29 : vector<1x256xi32> to vector<1x256xf32>
    %c0_19 = arith.constant 0 : index
    %c0_20 = arith.constant 0 : index
    %31 = vector.load %arg8[%c0_19, %c0_20] : memref<3x256xf32, #tpu.memory_space<vmem>>, vector<1x256xf32>
    tpu.vector_store %arg8[%c0_19, %c0_20], %20 {strides = array<i32>} : memref<3x256xf32, #tpu.memory_space<vmem>>, vector<1x256xf32>,
    %c1 = arith.constant 1 : index
    %c0_21 = arith.constant 0 : index
    %32 = vector.load %arg8[%c1, %c0_21] : memref<3x256xf32, #tpu.memory_space<vmem>>, vector<1x256xf32>
    tpu.vector_store %arg8[%c1, %c0_21], %26 {strides = array<i32>} : memref<3x256xf32, #tpu.memory_space<vmem>>, vector<1x256xf32>,
    %c2 = arith.constant 2 : index
    %c0_22 = arith.constant 0 : index
    %33 = vector.load %arg8[%c2, %c0_22] : memref<3x256xf32, #tpu.memory_space<vmem>>, vector<1x256xf32>
    tpu.vector_store %arg8[%c2, %c0_22], %30 {strides = array<i32>} : memref<3x256xf32, #tpu.memory_space<vmem>>, vector<1x256xf32>,
    return
  }
  func.func @transform_0(%arg0: i32) -> (i32, i32) {
    %c0_i32 = arith.constant 0 : i32
    %c0_i32_0 = arith.constant 0 : i32
    return %c0_i32, %arg0 : i32, i32
  }
  func.func @transform_1(%arg0: i32) -> (i32, i32) {
    %c0_i32 = arith.constant 0 : i32
    %c0_i32_0 = arith.constant 0 : i32
    %c0_i32_1 = arith.constant 0 : i32
    return %c0_i32, %c0_i32_0 : i32, i32
  }
  func.func @transform_2(%arg0: i32) -> (i32, i32) {
    %c0_i32 = arith.constant 0 : i32
    %c0_i32_0 = arith.constant 0 : i32
    %c0_i32_1 = arith.constant 0 : i32
    return %c0_i32, %c0_i32_0 : i32, i32
  }
  func.func @transform_3(%arg0: i32) -> (i32, i32) {
    %c0_i32 = arith.constant 0 : i32
    %c0_i32_0 = arith.constant 0 : i32
    %c0_i32_1 = arith.constant 0 : i32
    return %c0_i32, %c0_i32_0 : i32, i32
  }
  func.func @transform_4(%arg0: i32) -> (i32, i32) {
    %c0_i32 = arith.constant 0 : i32
    %c0_i32_0 = arith.constant 0 : i32
    %c0_i32_1 = arith.constant 0 : i32
    return %c0_i32, %c0_i32_0 : i32, i32
  }
  func.func @transform_5(%arg0: i32) -> (i32, i32) {
    %c0_i32 = arith.constant 0 : i32
    %c0_i32_0 = arith.constant 0 : i32
    %c0_i32_1 = arith.constant 0 : i32
    return %c0_i32, %c0_i32_0 : i32, i32
  }
  func.func @transform_6(%arg0: i32) -> (i32, i32) {
    %c0_i32 = arith.constant 0 : i32
    %c0_i32_0 = arith.constant 0 : i32
    %c0_i32_1 = arith.constant 0 : i32
    return %c0_i32, %c0_i32_0 : i32, i32
  }
  func.func @transform_7(%arg0: i32) -> (i32, i32) {
    %c0_i32 = arith.constant 0 : i32
    %c0_i32_0 = arith.constant 0 : i32
    return %c0_i32, %arg0 : i32, i32
  }
}

</mosaic_0001>

<bundles_post_ra>
// kernel: _forward_core.1
= control target key start
LH: loop header
LB: loop body
LE: loop exit
PB: predicated region body
PF: predicated region fallthrough
CT: control target
= control target key end

     0   :  { %s1008_s24 = smov 0   ;;  %s1010_s25 = smov 0   ;;  %s1160_s0 = inlined_call_operand.vmem [shape: f32[48,512], index: 0, kind: input, shape index: {}]   ;;  %s1161_s1 = inlined_call_operand.vmem [shape: f32[32,48], index: 1, kind: input, shape index: {}]   ;;  %s1162_s2 = inlined_call_operand.vmem [shape: f32[32,1], index: 2, kind: input, shape index: {}]   ;;  %s1163_s3 = inlined_call_operand.vmem [shape: f32[48,32], index: 3, kind: input, shape index: {}]   ;;  %s1164_s4 = inlined_call_operand.vmem [shape: f32[48,1], index: 4, kind: input, shape index: {}]   ;;  %s1165_s5 = inlined_call_operand.vmem [shape: f32[2,48], index: 5, kind: input, shape index: {}]   ;;  %s1166_s6 = inlined_call_operand.vmem [shape: f32[2,1], index: 6, kind: input, shape index: {}]   ;;  %s1167_s7 = inlined_call_operand.vmem [shape: f32[3,512], index: 7, kind: output, shape index: {}]  }
   0x1   :  { %s1012_s26 = smov 0  }
   0x2 LB: > { %s873_s27 = sadd.s32 4294967295, %s963_s26   ;;  %s1025_s28 = sadd.s32 1, %s963_s26   ;;  %s963_s26 = sphi %s1012_s26, %s1172_s26   ;;  %s959_s25 = sphi %s1010_s25, %s1171_s25   ;;  %s955_s24 = sphi %s1008_s24, %s1170_s24  }
   0x3   : > { %s21_s29 = ssub.s32 %s963_s26, %s1025_s28  ;;  %s24_s30 = sadd.s32 1, %s959_s25 }
   0x4   : > { %p22_p0 = scmp.eq.s32.totalorder %s21_s29, 0  ;;  %p31_p1 = scmp.ne.s32.totalorder %s959_s25, %s955_s24 }
   0x5   : > { %p32_p2 = scmp.eq.s32.totalorder %s963_s26, 0  ;;  %p876_p4 = scmp.ge.s32.totalorder %s963_s26, 2 }
   0x6   : > { %s1034_s8 = scalar_select %p22_p0, %s959_s25, %s24_s30  }
   0x7   : > { %p33_p3 = por %p32_p2, %p31_p1  ;;  %227 = sbr.rel (%p876_p4) target bundleno = 22 (0x16), region = 40 }
   0xc   : > { %230 = sbr.rel (!%p33_p3) target bundleno = 22 (0x16), region = 44  ;;  %s232_s9 = sand.u32 (%p33_p3), 1, %s959_s25  }
   0xd   : > { %s901_s10 = sshll.u32 (%p33_p3), %s963_s26, 4  ;;  %s902_s11 = smul.u32 (%p33_p3), 96, %s232_s9 }
   0xe   : > { %s237_s14 = scalar_lea.vmem (%p33_p3), %s1160_s0, %s901_s10 }
   0xf   : > { %v250_v0 = vld [vmem:[%s237_s14] sm:$0xff] (%p33_p3)  ;;  %v252_v1 = vld [vmem:[%s237_s14 + $0x8] sm:$0xff] (%p33_p3)  ;;  %s234_s15 = scalar_lea.vmem (%p33_p3), [#allocation2], %s902_s11 }
  0x10   : > { %v254_v2 = vld [vmem:[%s237_s14 + $0x20] sm:$0xff] (%p33_p3)  ;;  %v256_v3 = vld [vmem:[%s237_s14 + $0x28] sm:$0xff] (%p33_p3)  ;;  %251 = vst [vmem:[%s234_s15] sm:$0xff] (%p33_p3), %v250_v0  ;;  %253 = vst [vmem:[%s234_s15 + $0x8] sm:$0xff] (%p33_p3), %v252_v1 }
  0x11   : > { %v258_v4 = vld [vmem:[%s237_s14 + $0x40] sm:$0xff]  ;;  %v260_v5 = vld [vmem:[%s237_s14 + $0x48] sm:$0xff]  ;;  %255 = vst [vmem:[%s234_s15 + $0x10] sm:$0xff] %v254_v2  ;;  %257 = vst [vmem:[%s234_s15 + $0x18] sm:$0xff] %v256_v3 }
  0x12   : > { %259 = vst [vmem:[%s234_s15 + $0x20] sm:$0xff] %v258_v4  ;;  %261 = vst [vmem:[%s234_s15 + $0x28] sm:$0xff] %v260_v5  ;;  %v262_v6 = vld [vmem:[%s237_s14 + $0x60] sm:$0xff]  ;;  %v264_v7 = vld [vmem:[%s237_s14 + $0x68] sm:$0xff] }
  0x13   : > { %v266_v8 = vld [vmem:[%s237_s14 + $0x80] sm:$0xff]  ;;  %263 = vst [vmem:[%s234_s15 + $0x30] sm:$0xff] %v262_v6  ;;  %265 = vst [vmem:[%s234_s15 + $0x38] sm:$0xff] %v264_v7  ;;  %v268_v9 = vld [vmem:[%s237_s14 + $0x88] sm:$0xff] }
  0x14   : > { %267 = vst [vmem:[%s234_s15 + $0x40] sm:$0xff] %v266_v8  ;;  %v270_v10 = vld [vmem:[%s237_s14 + $0xa0] sm:$0xff]  ;;  %v272_v11 = vld [vmem:[%s237_s14 + $0xa8] sm:$0xff]  ;;  %269 = vst [vmem:[%s234_s15 + $0x48] sm:$0xff] %v268_v9 }
  0x15   : > { %271 = vst [vmem:[%s234_s15 + $0x50] sm:$0xff] %v270_v10  ;;  %273 = vst [vmem:[%s234_s15 + $0x58] sm:$0xff] %v272_v11 }
  0x16 PF: > { %p879_p5 = scmp.ge.s32.totalorder %s963_s26, 1  ;;  %p278_p6 = scmp.lt.s32.totalorder %s963_s26, 3 }
  0x18   : > { %p279_p7 = pnand %p879_p5, %p278_p6 }
  0x19   : > { %s285_s16 = sand.u32 (!%p279_p7), 1, %s955_s24   ;;  %s880_s9 = sshll.u32 (!%p279_p7), %s873_s27, 1 }
  0x1a   : > { %282 = sbr.rel (%p279_p7) target bundleno = 737 (0x2e1), region = 67  ;;  %p318_p8 = scmp.lt.s32.totalorder (!%p279_p7), %s880_s9, 3 }
  0x1b   : > { %s903_s17 = smul.u32 (!%p279_p7), 96, %s285_s16 }
  0x1d   : > { %s287_s24 = scalar_lea.vmem (!%p279_p7), [#allocation2], %s903_s17 }
  0x1f   : > { %v965_v12 = vmov 0.0   ;;  %v342_v13 = vld [vmem:[%s1162_s2 + $0x18] sm:$0xff]  ;;  %v966_v14 = vmov 0   ;;  %v340_v15 = vld [vmem:[%s1162_s2 + $0x8] sm:$0xff]  ;;  %v341_v16 = vld [vmem:[%s1162_s2 + $0x10] sm:$0xff]  ;;  %vm363_vm0 = vcmask 392192  }
  0x20   : > { %440 = vmatprep.mubr.f32.mxu0 %v965_v12  ;;  %598 = vmatprep.mubr.f32.mxu1 %v965_v12  ;;  %v338_v17 = vld [vmem:[%s287_s24 + $0x58] sm:$0xff]  ;;  %v337_v18 = vld [vmem:[%s287_s24 + $0x50] sm:$0xff]  ;;  %v336_v19 = vld [vmem:[%s287_s24 + $0x48] sm:$0xff]  ;;  %vm515_vm1 = vcmask 261120   ;;  %s1174_s9 = smov (!%p318_p8, %s880_s9), 3 }
  0x21   : > { %931 = vset.pattern.permute.xlu0 %v966_v14  ;;  %932 = vset.pattern.permute.xlu1 %v966_v14  ;;  %v335_v20 = vld [vmem:[%s287_s24 + $0x40] sm:$0xff]  ;;  %v334_v22 = vld [vmem:[%s287_s24 + $0x38] sm:$0xff]  ;;  %v333_v23 = vld [vmem:[%s287_s24 + $0x30] sm:$0xff]  ;;  %s881_s10 = sshll.u32 %s1174_s9, 2 }
  0x22   : > { %360 = vperm.xlu0 %931, %v342_v13   ;;  %350 = vperm.xlu1 %932, %v340_v15   ;;  %v339_v21 = vld [vmem:[%s1162_s2] sm:$0xff]  ;;  %v332_v24 = vld [vmem:[%s287_s24 + $0x28] sm:$0xff]  ;;  %v330_v28 = vld [vmem:[%s287_s24 + $0x18] sm:$0xff]  ;;  %s321_s11 = scalar_lea.vmem %s1167_s7, %s881_s10 }
  0x23   : > { %396 = vmatprep.subr.mxu0 %v338_v17  ;;  %v484_v25 = vld [vmem:[%s1164_s4 + $0x28] sm:$0xff]  ;;  %v331_v26 = vld [vmem:[%s287_s24 + $0x20] sm:$0xff]  ;;  %v329_v29 = vld [vmem:[%s287_s24 + $0x10] sm:$0xff] }
  0x24   : > { %397 = vmatpush1.msra.mxu0 %v337_v18  ;;  %v483_v27 = vld [vmem:[%s1164_s4 + $0x20] sm:$0xff]  ;;  %v328_v30 = vld [vmem:[%s287_s24 + $0x8] sm:$0xff]  ;;  %v482_v31 = vld [vmem:[%s1164_s4 + $0x18] sm:$0xff] }
  0x25   : > { %398 = vmatprep.subr.mxu0 %v336_v19  ;;  %v327_v32 = vld [vmem:[%s287_s24] sm:$0xff]  ;;  %v481_v33 = vld [vmem:[%s1164_s4 + $0x10] sm:$0xff]  ;;  %v480_v35 = vld [vmem:[%s1164_s4 + $0x8] sm:$0xff] }
  0x26   : > { %355 = vperm.xlu0 %931, %v341_v16   ;;  %399 = vmatpush1.msra.mxu0 %v335_v20  ;;  %v323_v34 = vld [vmem:[%s1161_s1] sm:$0xff]  ;;  %v324_v37 = vld [vmem:[%s1161_s1 + $0x8] sm:$0xff]  ;;  %v325_v39 = vld [vmem:[%s1161_s1 + $0x10] sm:$0xff] }
  0x27   : > { %345 = vperm.xlu1 %932, %v339_v21   ;;  %400 = vmatprep.subr.mxu0 %v334_v22  ;;  %v479_v36 = vld [vmem:[%s1164_s4] sm:$0xff]  ;;  %v326_v40 = vld [vmem:[%s1161_s1 + $0x18] sm:$0xff]  ;;  %v474_v6 = vld [vmem:[%s1163_s3 + $0x8] sm:$0xff] }
  0x28   : > { %401 = vmatpush1.msra.mxu0 %v333_v23  ;;  %v648_v38 = vld [vmem:[%s1166_s6] sm:$0x3]  ;;  %v475_v7 = vld [vmem:[%s1163_s3 + $0x10] sm:$0xff]  ;;  %v476_v8 = vld [vmem:[%s1163_s3 + $0x18] sm:$0xff] }
  0x29   : > { %402 = vmatprep.subr.mxu0 %v332_v24  ;;  %v473_v5 = vld [vmem:[%s1163_s3] sm:$0xff]  ;;  %v478_v10 = vld [vmem:[%s1163_s3 + $0x28] sm:$0xff] }
  0x2a   : > { %512 = vperm.xlu0 %931, %v484_v25   ;;  %403 = vmatpush1.msra.mxu0 %v331_v26  ;;  %v477_v9 = vld [vmem:[%s1163_s3 + $0x20] sm:$0xff] }
  0x2b   : > { %507 = vperm.xlu1 %932, %v483_v27   ;;  %404 = vmatprep.subr.mxu0 %v330_v28 }
  0x2c   : > { %405 = vmatpush1.msra.mxu0 %v329_v29 }
  0x2d   : > { %406 = vmatprep.subr.mxu0 %v328_v30 }
  0x2e   : > { %502 = vperm.xlu0 %931, %v482_v31   ;;  %407 = vmatpush1.msra.mxu0 %v327_v32 }
  0x2f   : > { %497 = vperm.xlu1 %932, %v481_v33   ;;  %882 = vmatmul.mubr.msk.f32.vlgmr.msra.gmra.mxu0 %vm363_vm0, %v323_v34 }
  0x30   : > { %446 = vmatprep.mubr.f32.mxu0 %v965_v12 }
  0x32   : > { %492 = vperm.xlu0 %931, %v480_v35  }
  0x33   : > { %487 = vperm.xlu1 %932, %v479_v36   ;;  %883 = vmatmul.mubr.msk.f32.gmra.mxu0 %vm363_vm0, %v324_v37 }
  0x34   : > { %452 = vmatprep.mubr.f32.mxu0 %v965_v12 }
  0x36   : > { %651 = vperm.xlu0 %931, %v648_v38  }
  0x37   : > { %884 = vmatmul.mubr.msk.f32.gmra.mxu0 %vm363_vm0, %v325_v39 }
  0x38   : > { %458 = vmatprep.mubr.f32.mxu0 %v965_v12 }
  0x3b   : > { %885 = vmatmul.mubr.msk.f32.gmra.mxu0 %vm363_vm0, %v326_v40 }
  0x3c   : > { %721 = vmatprep.mubr.f32.mxu0 %v965_v12 }
  0x9d   : > { %v361_v45 = vpop.permute.xlu0 %360  ;;  %v351_v48 = vpop.permute.xlu1 %350 }
  0xa1   : > { %v356_v50 = vpop.permute.xlu0 %355 }
  0xa2   : > { %v346_v56 = vpop.permute.xlu1 %345 }
  0xa5   : > { %v513_v20 = vpop.permute.xlu0 %512 }
  0xa6   : > { %v508_v22 = vpop.permute.xlu1 %507 }
  0xa9   : > { %v503_v25 = vpop.permute.xlu0 %502 }
  0xaa   : > { %v498_v30 = vpop.permute.xlu1 %497 }
  0xad   : > { %v493_v38 = vpop.permute.xlu0 %492 }
  0xef   : > { %v442_v41 = vpop.f32.mrf.mxu0 }
  0xf0   : > { %v443_v63 = vadd.f32 %v442_v41, %v346_v56 }
  0xf1   : > { %v444_v42 = vpop.f32.mrf.mxu0 }
  0xf2   : > { %v445_v61 = vadd.f32 %v444_v42, %v346_v56  ;;  %v465_v4 = vmax.f32 %v443_v63, 0.0 }
  0xf3   : > { %v448_v43 = vpop.f32.mrf.mxu0 }
  0xf4   : > { %v449_v59 = vadd.f32 %v448_v43, %v351_v48  ;;  %v466_v3 = vmax.f32 %v445_v61, 0.0  ;;  %v488_v43 = vpop.permute.xlu1 %487 }
  0xf5   : > { %v450_v44 = vpop.f32.mrf.mxu0 }
  0xf6   : > { %v451_v57 = vadd.f32 %v450_v44, %v351_v48  ;;  %v467_v2 = vmax.f32 %v449_v59, 0.0 }
  0xf7   : > { %v454_v46 = vpop.f32.mrf.mxu0 }
  0xf8   : > { %v455_v55 = vadd.f32 %v454_v46, %v356_v50  ;;  %v468_v1 = vmax.f32 %v451_v57, 0.0  ;;  %v752_v57 = vlaneseq }
  0xf9   : > { %v456_v47 = vpop.f32.mrf.mxu0 }
  0xfa   : > { %v457_v53 = vadd.f32 %v456_v47, %v356_v50  ;;  %v469_v0 = vmax.f32 %v455_v55, 0.0  ;;  %v967_v55 = vmov 1966171168   ;;  %v753_v59 = vshrl.u32 %v752_v57, 7 }
  0xfb   : > { %v460_v49 = vpop.f32.mrf.mxu0  ;;  %v750_v56 = vunpack.c.l.s4 %v967_v55  ;;  %vm1138_vm2 = vcmp.lt.s32.totalorder %v752_v57, 256 }
  0xfc   : > { %v461_v51 = vadd.f32 %v460_v49, %v361_v45  ;;  %v470_v62 = vmax.f32 %v457_v53, 0.0 }
  0xfd   : > { %v462_v52 = vpop.f32.mrf.mxu0 }
  0xfe   : > { %v463_v54 = vadd.f32 %v462_v52, %v361_v45  ;;  %v471_v60 = vmax.f32 %v461_v51, 0.0 }
 0x100   : > { %v472_v58 = vmax.f32 %v463_v54, 0.0  ;;  %v647_v54 = vld [vmem:[%s1165_s5] sm:$0x3] }
 0x102   : > { %558 = vmatprep.subr.mxu1 %v472_v58  ;;  %v751_v58 = vunpack.c.0.s8 %v750_v56 }
 0x103   : > { %559 = vmatpush1.msra.mxu1 %v471_v60  ;;  %v652_v60 = vpop.permute.xlu0 %651 }
 0x104   : > { %560 = vmatprep.subr.mxu1 %v470_v62 }
 0x105   : > { %561 = vmatpush1.msra.mxu1 %v469_v0 }
 0x106   : > { %562 = vmatprep.subr.mxu1 %v468_v1 }
 0x107   : > { %563 = vmatpush1.msra.mxu1 %v467_v2  ;;  %v754_v2 = vsub.s32 %v751_v58, %v753_v59 }
 0x108   : > { %564 = vmatprep.subr.mxu1 %v466_v3 }
 0x109   : > { %565 = vmatpush1.msra.mxu1 %v465_v4 }
 0x10a   : > { %886 = vmatmul.mubr.msk.f32.vlgmr.msra.gmra.mxu1 %vm515_vm1, %v473_v5 }
 0x10b   : > { %604 = vmatprep.mubr.f32.mxu1 %v965_v12 }
 0x10e   : > { %887 = vmatmul.mubr.msk.f32.gmra.mxu1 %vm515_vm1, %v474_v6 }
 0x10f   : > { %610 = vmatprep.mubr.f32.mxu1 %v965_v12 }
 0x112   : > { %888 = vmatmul.mubr.msk.f32.gmra.mxu1 %vm515_vm1, %v475_v7 }
 0x113   : > { %616 = vmatprep.mubr.f32.mxu1 %v965_v12 }
 0x116   : > { %889 = vmatmul.mubr.msk.f32.gmra.mxu1 %vm515_vm1, %v476_v8 }
 0x117   : > { %622 = vmatprep.mubr.f32.mxu1 %v965_v12 }
 0x11a   : > { %890 = vmatmul.mubr.msk.f32.gmra.mxu1 %vm515_vm1, %v477_v9 }
 0x11b   : > { %628 = vmatprep.mubr.f32.mxu1 %v965_v12 }
 0x11e   : > { %891 = vmatmul.mubr.msk.f32.gmra.mxu1 %vm515_vm1, %v478_v10 }
 0x1ca   : > { %v600_v11 = vpop.f32.mrf.mxu1 }
 0x1cb   : > { %v601_v48 = vadd.f32 %v600_v11, %v488_v43 }
 0x1cc   : > { %v602_v13 = vpop.f32.mrf.mxu1 }
 0x1cd   : > { %v603_v46 = vadd.f32 %v602_v13, %v488_v43  ;;  %v635_v53 = vmax.f32 %v601_v48, 0.0 }
 0x1ce   : > { %v606_v14 = vpop.f32.mrf.mxu1 }
 0x1cf   : > { %v607_v44 = vadd.f32 %v606_v14, %v493_v38  ;;  %v636_v52 = vmax.f32 %v603_v46, 0.0 }
 0x1d0   : > { %v608_v15 = vpop.f32.mrf.mxu1 }
 0x1d1   : > { %v609_v41 = vadd.f32 %v608_v15, %v493_v38  ;;  %v637_v51 = vmax.f32 %v607_v44, 0.0 }
 0x1d2   : > { %v612_v16 = vpop.f32.mrf.mxu1 }
 0x1d3   : > { %v613_v39 = vadd.f32 %v612_v16, %v498_v30  ;;  %v638_v50 = vmax.f32 %v609_v41, 0.0 }
 0x1d4   : > { %v614_v17 = vpop.f32.mrf.mxu1 }
 0x1d5   : > { %v615_v36 = vadd.f32 %v614_v17, %v498_v30  ;;  %v639_v49 = vmax.f32 %v613_v39, 0.0 }
 0x1d6   : > { %v618_v18 = vpop.f32.mrf.mxu1 }
 0x1d7   : > { %v619_v34 = vadd.f32 %v618_v18, %v503_v25  ;;  %v640_v47 = vmax.f32 %v615_v36, 0.0 }
 0x1d8   : > { %v620_v19 = vpop.f32.mrf.mxu1 }
 0x1d9   : > { %v621_v32 = vadd.f32 %v620_v19, %v503_v25  ;;  %v641_v45 = vmax.f32 %v619_v34, 0.0 }
 0x1da   : > { %v624_v21 = vpop.f32.mrf.mxu1 }
 0x1db   : > { %v625_v31 = vadd.f32 %v624_v21, %v508_v22  ;;  %v642_v42 = vmax.f32 %v621_v32, 0.0 }
 0x1dc   : > { %v626_v23 = vpop.f32.mrf.mxu1 }
 0x1dd   : > { %v627_v28 = vadd.f32 %v626_v23, %v508_v22  ;;  %v643_v40 = vmax.f32 %v625_v31, 0.0 }
 0x1de   : > { %v630_v24 = vpop.f32.mrf.mxu1 }
 0x1df   : > { %v631_v26 = vadd.f32 %v630_v24, %v513_v20  ;;  %v644_v37 = vmax.f32 %v627_v28, 0.0 }
 0x1e0   : > { %v632_v27 = vpop.f32.mrf.mxu1 }
 0x1e1   : > { %v633_v29 = vadd.f32 %v632_v27, %v513_v20  ;;  %v645_v35 = vmax.f32 %v631_v26, 0.0 }
 0x1e3   : > { %v646_v33 = vmax.f32 %v633_v29, 0.0 }
 0x1e5   : > { %677 = vmatprep.subr.mxu0 %v646_v33 }
 0x1e6   : > { %678 = vmatpush1.msra.mxu0 %v645_v35 }
 0x1e7   : > { %679 = vmatprep.subr.mxu0 %v644_v37 }
 0x1e8   : > { %680 = vmatpush1.msra.mxu0 %v643_v40 }
 0x1e9   : > { %681 = vmatprep.subr.mxu0 %v642_v42 }
 0x1ea   : > { %682 = vmatpush1.msra.mxu0 %v641_v45 }
 0x1eb   : > { %683 = vmatprep.subr.mxu0 %v640_v47 }
 0x1ec   : > { %684 = vmatpush1.msra.mxu0 %v639_v49 }
 0x1ed   : > { %685 = vmatprep.subr.mxu0 %v638_v50 }
 0x1ee   : > { %686 = vmatpush1.msra.mxu0 %v637_v51 }
 0x1ef   : > { %687 = vmatprep.subr.mxu0 %v636_v52 }
 0x1f0   : > { %688 = vmatpush1.msra.mxu0 %v635_v53 }
 0x1f1   : > { %892 = vmatmul.mubr.msk.f32.vlgmr.msra.gmra.mxu0 %vm363_vm0, %v647_v54 }
 0x2b1   : > { %v723_v61 = vpop.f32.mrf.mxu0 }
 0x2b2   : > { %v724_v62 = vadd.f32 %v723_v61, %v652_v60 }
 0x2b3   : > { %v725_v63 = vpop.f32.mrf.mxu0 }
 0x2b4   : > { %v893_v0 = vmul.f32 -1.442695, %v724_v62  ;;  %v726_v1 = vadd.f32 %v725_v63, %v652_v60 }
 0x2b6   : > { %933 = vpow2.f32 %v893_v0  ;;  %v894_v3 = vmul.f32 -1.442695, %v726_v1  ;;  %v748_v4 = vcombine.low %v724_v62, %v726_v1 }
 0x2b8   : > { %935 = vpow2.f32 %v894_v3  ;;  %v755_v5 = vrot.slane %v748_v4, %v754_v2 }
 0x2ba   : > { %v762_v7 = vrot.slane %v755_v5, %v754_v2 }
 0x2bc   : > { %768 = vst.msk [vmem:[%s321_s11] ss:$4 sm:$0x3] %vm1138_vm2, %v762_v7 }
 0x2c3   : > { %v934_v8 = vpop.eup %933 }
 0x2c4   : > { %v734_v9 = vadd.f32 1.0, %v934_v8 }
 0x2c5   : > { %v936_v10 = vpop.eup %935 }
 0x2c6   : > { %937 = vrcp.f32 %v734_v9  ;;  %v735_v11 = vadd.f32 1.0, %v936_v10 }
 0x2c8   : > { %939 = vrcp.f32 %v735_v11 }
 0x2d3   : > { %v938_v13 = vpop.eup %937 }
 0x2d4   : > { %vm740_vm3 = vcmp.gt.f32.partialorder %v938_v13, 0.5 }
 0x2d5   : > { %v940_v14 = vpop.eup %939  ;;  %v895_v16 = vsel %vm740_vm3, 1.0, %v965_v12 }
 0x2d6   : > { %vm741_vm4 = vcmp.gt.f32.partialorder %v940_v14, 0.5  ;;  %v771_v15 = vcombine.low %v938_v13, %v940_v14 }
 0x2d7   : > { %v896_v17 = vsel %vm741_vm4, 1.0, %v965_v12 }
 0x2d8   : > { %v778_v18 = vrot.slane %v771_v15, %v754_v2  ;;  %v792_v19 = vcombine.low %v895_v16, %v896_v17 }
 0x2da   : > { %v779_v20 = vcombine.high %v778_v18, %v778_v18  ;;  %v799_v21 = vrot.slane %v792_v19, %v754_v2 }
 0x2dc   : > { %v786_v22 = vrot.slane %v779_v20, %v754_v2  ;;  %v800_v23 = vcombine.high %v799_v21, %v799_v21 }
 0x2de   : > { %897 = vst.msk [vmem:[%s321_s11 + $0x1] ss:$4 sm:$0x3] %vm1138_vm2, %v786_v22  ;;  %v807_v24 = vrot.slane %v800_v23, %v754_v2 }
 0x2e0   : > { %898 = vst.msk [vmem:[%s321_s11 + $0x2] ss:$4 sm:$0x3] %vm1138_vm2, %v807_v24 }
 0x2e1 PF: > { %p14_p9 = scmp.ge.s32.totalorder %s1025_s28, 4   ;;  %s1170_s24 = smov %s959_s25 }
 0x2e2   : > { %s1171_s25 = smov %s1034_s8  ;;  %s1172_s26 = smov %s1025_s28 }
 0x2e3   :  { %16 = sbr.rel (!%p14_p9) target bundleno = 2 (0x2), region = 108 }

</bundles_post_ra>
